<compile_context>
chip_gen: v6e
topology: v6e:2x2x1
jax: 0.10.0
libtpu: 0.0.40
codegen_flags: <defaults>
</compile_context>

<pallas_src>
import jax
import jax.numpy as jnp
from jax.experimental import pallas as pl
from jax.experimental.pallas import tpu as pltpu


# ----------------------------------------------------------------------------
# Interpolation weights (align_corners=True bilinear)
# ----------------------------------------------------------------------------
def _bilinear_matrix(in_size: int, out_size: int) -> jnp.ndarray:
    """Interpolation matrix W (out_size, in_size) for align_corners=True bilinear."""
    if out_size == 1:
        src = jnp.zeros((1,), dtype=jnp.float32)
    else:
        src = jnp.arange(out_size, dtype=jnp.float32) * (in_size - 1) / (out_size - 1)
    lo = jnp.floor(src).astype(jnp.int32)
    lo = jnp.clip(lo, 0, in_size - 1)
    hi = jnp.clip(lo + 1, 0, in_size - 1)
    frac = src - lo.astype(jnp.float32)
    w_lo = jax.nn.one_hot(lo, in_size, dtype=jnp.float32) * (1.0 - frac)[:, None]
    w_hi = jax.nn.one_hot(hi, in_size, dtype=jnp.float32) * frac[:, None]
    return w_lo + w_hi


def _round_up(x: int, m: int) -> int:
    return (x + m - 1) // m * m


# ----------------------------------------------------------------------------
# Kernels
# ----------------------------------------------------------------------------
def _upsample_kron_kernel(x_ref, kt_ref, o_ref):
    # x_ref : (TB, H*W)            per-tile input
    # kt_ref: (H*W, Hout*Wout)     kron(Wh, Ww)^T, resident across the grid
    # o_ref : (TB, Hout*Wout)      lane-dense output slab
    o_ref[...] = jnp.dot(
        x_ref[...], kt_ref[...], preferred_element_type=jnp.float32
    ).astype(o_ref.dtype)


def _upsample_two_pass_kernel(x_ref, wwt_ref, wh_ref, o_ref):
    # Fallback for large spatial sizes (kron matrix would not fit VMEM).
    # x_ref  : (TB, H, W)
    # wwt_ref: (W, Wout)
    # wh_ref : (Hout, H)
    # o_ref  : (TB, Hout, Wout)
    tb, h, w = x_ref.shape
    wout = wwt_ref.shape[1]
    # Column pass folded into one big MXU matmul: (TB*H, W) @ (W, Wout).
    t = jnp.dot(
        x_ref[...].reshape(tb * h, w), wwt_ref[...],
        preferred_element_type=jnp.float32,
    )
    t = t.reshape(tb, h, wout).astype(x_ref.dtype)
    # Row pass, batched over TB (only used when H/Hout/Wout are large, so the
    # per-batch matmuls are well shaped for the MXU).
    out = jnp.einsum(
        "oh,bhv->bov", wh_ref[...], t, preferred_element_type=jnp.float32
    )
    o_ref[...] = out.astype(o_ref.dtype)


# ----------------------------------------------------------------------------
# Wrapper
# ----------------------------------------------------------------------------
_PIPELINE_BUDGET_BYTES = 16 << 20   # double-buffered in+out tiles (safe on v5e/v6e/v7x)
_VMEM_LIMIT_BYTES = 32 << 20
_KRON_MAX_BYTES = 4 << 20           # max resident kron weight per buffer


def _tile_over_batch(b: int, per_row_bytes: int):
    """Pick tile size TB (multiple of 8) and padded batch for grid over B."""
    cap = max(8, (_PIPELINE_BUDGET_BYTES // max(per_row_bytes, 1)) // 8 * 8)
    b8 = _round_up(b, 8)
    num_blocks = max(1, -(-b8 // cap))          # ceil
    tb = _round_up(-(-b8 // num_blocks), 8)     # minimize padding
    b_pad = num_blocks * tb
    return tb, b_pad, num_blocks


def spatial_upsample(x_nchw: jnp.ndarray, scale_factor: int = 2,
                     interpolation_mode: str = "bilinear") -> jnp.ndarray:
    """Matches nn.functional.interpolate(x, scale_factor=scale_factor,
    mode='bilinear', align_corners=True) on NCHW input."""
    if interpolation_mode != "bilinear":
        # TODO(synk): only the module's default 'bilinear' path is implemented.
        raise NotImplementedError("only bilinear interpolation is implemented")

    n, c, h, w = x_nchw.shape
    h_out, w_out = h * scale_factor, w * scale_factor
    b = n * c

    in_dtype = x_nchw.dtype
    compute_dtype = in_dtype if in_dtype in (jnp.bfloat16, jnp.float32) else jnp.float32
    dtype_bytes = jnp.dtype(compute_dtype).itemsize

    wh = _bilinear_matrix(h, h_out)   # (Hout, H), f32
    ww = _bilinear_matrix(w, w_out)   # (Wout, W), f32

    kron_bytes = (h * w) * (h_out * w_out) * dtype_bytes
    use_kron = kron_bytes <= _KRON_MAX_BYTES

    if use_kron:
        # KT[(h,w),(o,v)] = Wh[o,h] * Ww[v,w]  =>  x_flat @ KT == bilinear upsample.
        kt = jnp.einsum("oh,vw->hwov", wh, ww).reshape(h * w, h_out * w_out)
        kt = kt.astype(compute_dtype)

        x_flat = x_nchw.reshape(b, h * w).astype(compute_dtype)

        per_row_bytes = 2 * (h * w + h_out * w_out) * dtype_bytes
        tb, b_pad, num_blocks = _tile_over_batch(b, per_row_bytes)
        if b_pad > b:
            x_flat = jnp.pad(x_flat, ((0, b_pad - b), (0, 0)))

        cost = pl.CostEstimate(
            flops=2 * b_pad * (h * w) * (h_out * w_out),
            transcendentals=0,
            bytes_accessed=(b_pad * h * w + b_pad * h_out * w_out) * dtype_bytes
            + kron_bytes,
        )

        out_flat = pl.pallas_call(
            _upsample_kron_kernel,
            out_shape=jax.ShapeDtypeStruct((b_pad, h_out * w_out), in_dtype),
            grid=(num_blocks,),
            in_specs=[
                pl.BlockSpec((tb, h * w), lambda i: (i, 0)),
                pl.BlockSpec((h * w, h_out * w_out), lambda i: (0, 0)),
            ],
            out_specs=pl.BlockSpec((tb, h_out * w_out), lambda i: (i, 0)),
            compiler_params=pltpu.CompilerParams(
                dimension_semantics=("parallel",),
                vmem_limit_bytes=_VMEM_LIMIT_BYTES,
            ),
            cost_estimate=cost,
        )(x_flat, kt)

        return out_flat[:b].reshape(n, c, h_out, w_out)

    # ---------------- two-pass fallback for large spatial sizes ----------------
    wwt = ww.T.astype(compute_dtype)   # (W, Wout)
    wh_c = wh.astype(compute_dtype)    # (Hout, H)
    x3 = x_nchw.reshape(b, h, w).astype(compute_dtype)

    per_row_bytes = (
        2 * h * w * dtype_bytes            # double-buffered input tile
        + 2 * h_out * w_out * dtype_bytes  # double-buffered output tile
        + h * w_out * 4                    # f32 intermediate (column pass)
        + h_out * w_out * 4                # f32 result before cast
    )
    tb, b_pad, num_blocks = _tile_over_batch(b, per_row_bytes)
    if b_pad > b:
        x3 = jnp.pad(x3, ((0, b_pad - b), (0, 0), (0, 0)))

    out3 = pl.pallas_call(
        _upsample_two_pass_kernel,
        out_shape=jax.ShapeDtypeStruct((b_pad, h_out, w_out), in_dtype),
        grid=(num_blocks,),
        in_specs=[
            pl.BlockSpec((tb, h, w), lambda i: (i, 0, 0)),
            pl.BlockSpec((w, w_out), lambda i: (0, 0)),
            pl.BlockSpec((h_out, h), lambda i: (0, 0)),
        ],
        out_specs=pl.BlockSpec((tb, h_out, w_out), lambda i: (i, 0, 0)),
        compiler_params=pltpu.CompilerParams(
            dimension_semantics=("parallel",),
            vmem_limit_bytes=_VMEM_LIMIT_BYTES,
        ),
    )(x3, wwt, wh_c)

    return out3[:b].reshape(n, c, h_out, w_out)


# ----------------------------------------------------------------------------
# Pure-JAX reference (same separable formulation) for correctness checking.
# ----------------------------------------------------------------------------
def _reference_upsample(x_nchw: jnp.ndarray, scale_factor: int = 2) -> jnp.ndarray:
    n, c, h, w = x_nchw.shape
    h_out, w_out = h * scale_factor, w * scale_factor
    wh = _bilinear_matrix(h, h_out)
    ww = _bilinear_matrix(w, w_out)
    return jnp.einsum("oh,nchw,vw->ncov", wh, x_nchw.astype(jnp.float32), ww).astype(
        x_nchw.dtype
    )


if __name__ == "__main__":
    key = jax.random.PRNGKey(0)
    # Small NCHW feature map consistent with the module.
    x = jax.random.normal(key, (2, 4, 16, 16), dtype=jnp.float32)

    out = spatial_upsample(x, scale_factor=2)
    out = jax.block_until_ready(out)

    assert out.shape == (2, 4, 32, 32), out.shape
    ref = _reference_upsample(x, scale_factor=2)
    assert jnp.allclose(out, ref, atol=1e-5, rtol=1e-5), float(
        jnp.max(jnp.abs(out.astype(jnp.float32) - ref.astype(jnp.float32)))
    )

    print("KERNEL_OK")
</pallas_src>

<mosaic_0001>
module attributes {stable_mosaic.version = 11 : i64} {
  func.func @_upsample_kron_kernel(%arg0: i32, %arg1: memref<8x256xf32, #tpu.memory_space<vmem>>, %arg2: memref<256x1024xf32, #tpu.memory_space<vmem>>, %arg3: memref<8x1024xf32, #tpu.memory_space<vmem>>) attributes {dimension_semantics = [#tpu.dimension_semantics<parallel>], iteration_bounds = array<i64: 1>, scalar_prefetch = 0 : i64, scratch_operands = 0 : i64, tpu.core_type = #tpu.core_type<tc>, window_params = [{transform_indices = @transform_0, window_bounds = array<i64: 8, 256>}, {pipeline_mode = #tpu.pipeline_mode<synchronous>, transform_indices = @transform_1, window_bounds = array<i64: 256, 1024>}, {transform_indices = @transform_2, window_bounds = array<i64: 8, 1024>}]} {
    %c0 = arith.constant 0 : index
    %c0_0 = arith.constant 0 : index
    %0 = vector.load %arg1[%c0, %c0_0] : memref<8x256xf32, #tpu.memory_space<vmem>>, vector<8x256xf32>
    %c0_1 = arith.constant 0 : index
    %c0_2 = arith.constant 0 : index
    %1 = vector.load %arg2[%c0_1, %c0_2] : memref<256x1024xf32, #tpu.memory_space<vmem>>, vector<256x1024xf32>
    %cst = arith.constant dense<0.000000e+00> : vector<8x1024xf32>
    %2 = tpu.matmul %0, %1, %cst {dimension_numbers = #tpu.dot_dimension_numbers<[1], [0], [0], [1], [0, 0, 1, 1], [], []>} : vector<8x256xf32>, vector<256x1024xf32>, vector<8x1024xf32> -> vector<8x1024xf32>
    %c0_3 = arith.constant 0 : index
    %c0_4 = arith.constant 0 : index
    %3 = vector.load %arg3[%c0_3, %c0_4] : memref<8x1024xf32, #tpu.memory_space<vmem>>, vector<8x1024xf32>
    tpu.vector_store %arg3[%c0_3, %c0_4], %2 {strides = array<i32>} : memref<8x1024xf32, #tpu.memory_space<vmem>>, vector<8x1024xf32>,
    return
  }
  func.func @transform_0(%arg0: i32) -> (i32, i32) {
    %c0_i32 = arith.constant 0 : i32
    %c0_i32_0 = arith.constant 0 : i32
    return %arg0, %c0_i32 : i32, i32
  }
  func.func @transform_1(%arg0: i32) -> (i32, i32) {
    %c0_i32 = arith.constant 0 : i32
    %c0_i32_0 = arith.constant 0 : i32
    %c0_i32_1 = arith.constant 0 : i32
    return %c0_i32, %c0_i32_0 : i32, i32
  }
  func.func @transform_2(%arg0: i32) -> (i32, i32) {
    %c0_i32 = arith.constant 0 : i32
    %c0_i32_0 = arith.constant 0 : i32
    return %arg0, %c0_i32 : i32, i32
  }
}

</mosaic_0001>

<bundles_post_ra>
// kernel: tpu_custom_call.1
= control target key start
LH: loop header
LB: loop body
LE: loop exit
PB: predicated region body
PF: predicated region fallthrough
CT: control target
= control target key end

     0   :  { %7 = vsyncpa [#allocation3], 0  ;;  %s716_s0 = inlined_call_operand.hbm [shape: f32[8,256], index: 0, kind: input, shape index: {}]   ;;  %s717_s1 = inlined_call_operand.hbm [shape: f32[256,1024], index: 1, kind: input, shape index: {}]   ;;  %s718_s2 = inlined_call_operand.hbm [shape: f32[8,1024], index: 2, kind: output, shape index: {}]  }
   0x1   :  { %8 = vsyncpa [#allocation6], 0 }
   0x2   :  { %9 = vsyncpa [#allocation4], 0  ;;  %s675_s9 = smov [#allocation2]   ;;  %s676_s11 = smov [#allocation5]  }
   0x3   :  { %s16_s10 = sshll.u32 %s675_s9, 4  ;;  %s25_s12 = sshll.u32 %s676_s11, 4  ;;  %s17_s10 = int_to_ptr.vmem [resolvable:$true] %s16_s10  ;;  %s26_s12 = int_to_ptr.vmem [resolvable:$true] %s25_s12 }
   0x4   :  { %s617_s13 = scalar_lea.vmem %s17_s10, 256  ;;  %p622_p1 = scmp.lt.s32.totalorder %s17_s10, %s17_s10 }
   0x5   :  { %p618_p0 = scmp.ne.s32.totalorder %s17_s10, %s617_s13  ;;  %p623_p2 = scmp.lt.s32.totalorder %s617_s13, %s617_s13 }
   0x7   :  { %p624_p3 = por %p623_p2, %p622_p1 }
   0x9   :  { %p625_p4 = pnand %p624_p3, %p618_p0 }
   0xb   :  { %628 = shalt.err (!%p625_p4)
}
   0xc   :  { %19 = dma.hbm_to_vmem [thread:$0]  %s716_s0, 256, %s17_s10, [#allocation3]  }
   0xd   :  { %s637_s16 = scalar_lea.vmem %s26_s12, 32768  ;;  %p642_p6 = scmp.lt.s32.totalorder %s26_s12, %s26_s12 }
   0xe   :  { %p638_p5 = scmp.ne.s32.totalorder %s26_s12, %s637_s16  ;;  %p643_p7 = scmp.lt.s32.totalorder %s637_s16, %s637_s16 }
  0x10   :  { %p644_p8 = por %p643_p7, %p642_p6 }
  0x12   :  { %p645_p9 = pnand %p644_p8, %p638_p5 }
  0x14   :  { %648 = shalt.err (!%p645_p9)
}
  0x15   :  { %s677_s17 = smov 1024   ;;  %s678_s18 = smov 64  }
  0x16   :  { %31 = dma.hbm_to_vmem [thread:$0]  %s717_s1, 32768, %s26_s12, [#allocation6], %s677_s17, %s677_s17, %s678_s18  }
  0x17   :  { %669 = dma.done.wait [#allocation3], 256  }
  0x18   :  { %670 = vsyncadd [#allocation3], 4294967040 }
  0x19   :  { %671 = dma.done.wait [#allocation6], 32768  }
  0x1a   :  { %672 = vsyncadd [#allocation6], 4294934528  ;;  %v161_v0 = vld [vmem:[#allocation5 + $0x3c8] sm:$0xff]  ;;  %v163_v1 = vld [vmem:[#allocation5 + $0x3d8] sm:$0xff]  ;;  %s679_s0 = smov [#allocation7]  }
  0x1b   :  { %v160_v2 = vld [vmem:[#allocation5 + $0x3c0] sm:$0xff]  ;;  %296 = vmatprep.subr.mxu0 %v161_v0  ;;  %367 = vmatprep.subr.mxu1 %v163_v1  ;;  %v162_v3 = vld [vmem:[#allocation5 + $0x3d0] sm:$0xff]  ;;  %v153_v4 = vld [vmem:[#allocation5 + $0x388] sm:$0xff]  ;;  %s594_s1 = sshll.u32 %s679_s0, 4  ;;  %s595_s1 = int_to_ptr.vmem [resolvable:$true] %s594_s1 }
  0x1c   :  { %v155_v5 = vld [vmem:[#allocation5 + $0x398] sm:$0xff]  ;;  %297 = vmatpush1.msra.mxu0 %v160_v2  ;;  %368 = vmatpush1.msra.mxu1 %v162_v3  ;;  %v152_v6 = vld [vmem:[#allocation5 + $0x380] sm:$0xff]  ;;  %v154_v7 = vld [vmem:[#allocation5 + $0x390] sm:$0xff]  ;;  %s649_s21 = scalar_lea.vmem %s595_s1, 1024  ;;  %p654_p11 = scmp.lt.s32.totalorder %s595_s1, %s595_s1 }
  0x1d   :  { %v145_v8 = vld [vmem:[#allocation5 + $0x348] sm:$0xff]  ;;  %298 = vmatprep.subr.mxu0 %v153_v4  ;;  %369 = vmatprep.subr.mxu1 %v155_v5  ;;  %v147_v9 = vld [vmem:[#allocation5 + $0x358] sm:$0xff]  ;;  %v144_v10 = vld [vmem:[#allocation5 + $0x340] sm:$0xff]  ;;  %p650_p10 = scmp.ne.s32.totalorder %s595_s1, %s649_s21  ;;  %p655_p12 = scmp.lt.s32.totalorder %s649_s21, %s649_s21 }
  0x1e   :  { %v146_v11 = vld [vmem:[#allocation5 + $0x350] sm:$0xff]  ;;  %299 = vmatpush1.msra.mxu0 %v152_v6  ;;  %370 = vmatpush1.msra.mxu1 %v154_v7  ;;  %v137_v12 = vld [vmem:[#allocation5 + $0x308] sm:$0xff]  ;;  %v139_v13 = vld [vmem:[#allocation5 + $0x318] sm:$0xff] }
  0x1f   :  { %300 = vmatprep.subr.mxu0 %v145_v8  ;;  %371 = vmatprep.subr.mxu1 %v147_v9  ;;  %v136_v14 = vld [vmem:[#allocation5 + $0x300] sm:$0xff]  ;;  %v138_v15 = vld [vmem:[#allocation5 + $0x310] sm:$0xff]  ;;  %v129_v16 = vld [vmem:[#allocation5 + $0x2c8] sm:$0xff]  ;;  %p656_p13 = por %p655_p12, %p654_p11 }
  0x20   :  { %301 = vmatpush1.msra.mxu0 %v144_v10  ;;  %372 = vmatpush1.msra.mxu1 %v146_v11  ;;  %v131_v17 = vld [vmem:[#allocation5 + $0x2d8] sm:$0xff]  ;;  %v128_v18 = vld [vmem:[#allocation5 + $0x2c0] sm:$0xff]  ;;  %v130_v19 = vld [vmem:[#allocation5 + $0x2d0] sm:$0xff] }
  0x21   :  { %302 = vmatprep.subr.mxu0 %v137_v12  ;;  %373 = vmatprep.subr.mxu1 %v139_v13  ;;  %v121_v20 = vld [vmem:[#allocation5 + $0x288] sm:$0xff]  ;;  %v123_v21 = vld [vmem:[#allocation5 + $0x298] sm:$0xff]  ;;  %v120_v22 = vld [vmem:[#allocation5 + $0x280] sm:$0xff]  ;;  %p657_p0 = pnand %p656_p13, %p650_p10 }
  0x22   :  { %303 = vmatpush1.msra.mxu0 %v136_v14  ;;  %374 = vmatpush1.msra.mxu1 %v138_v15  ;;  %v122_v23 = vld [vmem:[#allocation5 + $0x290] sm:$0xff]  ;;  %v113_v24 = vld [vmem:[#allocation5 + $0x248] sm:$0xff]  ;;  %v115_v25 = vld [vmem:[#allocation5 + $0x258] sm:$0xff] }
  0x23   :  { %304 = vmatprep.subr.mxu0 %v129_v16  ;;  %375 = vmatprep.subr.mxu1 %v131_v17  ;;  %v112_v26 = vld [vmem:[#allocation5 + $0x240] sm:$0xff]  ;;  %v114_v27 = vld [vmem:[#allocation5 + $0x250] sm:$0xff]  ;;  %v105_v28 = vld [vmem:[#allocation5 + $0x208] sm:$0xff] }
  0x24   :  { %305 = vmatpush1.msra.mxu0 %v128_v18  ;;  %376 = vmatpush1.msra.mxu1 %v130_v19  ;;  %v107_v29 = vld [vmem:[#allocation5 + $0x218] sm:$0xff]  ;;  %v104_v30 = vld [vmem:[#allocation5 + $0x200] sm:$0xff]  ;;  %v106_v31 = vld [vmem:[#allocation5 + $0x210] sm:$0xff] }
  0x25   :  { %306 = vmatprep.subr.mxu0 %v121_v20  ;;  %377 = vmatprep.subr.mxu1 %v123_v21  ;;  %v97_v32 = vld [vmem:[#allocation5 + $0x1c8] sm:$0xff]  ;;  %v99_v33 = vld [vmem:[#allocation5 + $0x1d8] sm:$0xff]  ;;  %v96_v34 = vld [vmem:[#allocation5 + $0x1c0] sm:$0xff] }
  0x26   :  { %307 = vmatpush1.msra.mxu0 %v120_v22  ;;  %378 = vmatpush1.msra.mxu1 %v122_v23  ;;  %v98_v35 = vld [vmem:[#allocation5 + $0x1d0] sm:$0xff]  ;;  %v89_v36 = vld [vmem:[#allocation5 + $0x188] sm:$0xff]  ;;  %v91_v37 = vld [vmem:[#allocation5 + $0x198] sm:$0xff] }
  0x27   :  { %308 = vmatprep.subr.mxu0 %v113_v24  ;;  %379 = vmatprep.subr.mxu1 %v115_v25  ;;  %v88_v38 = vld [vmem:[#allocation5 + $0x180] sm:$0xff]  ;;  %v90_v39 = vld [vmem:[#allocation5 + $0x190] sm:$0xff]  ;;  %v81_v40 = vld [vmem:[#allocation5 + $0x148] sm:$0xff] }
  0x28   :  { %309 = vmatpush1.msra.mxu0 %v112_v26  ;;  %380 = vmatpush1.msra.mxu1 %v114_v27  ;;  %v83_v41 = vld [vmem:[#allocation5 + $0x158] sm:$0xff]  ;;  %v80_v42 = vld [vmem:[#allocation5 + $0x140] sm:$0xff]  ;;  %v82_v43 = vld [vmem:[#allocation5 + $0x150] sm:$0xff] }
  0x29   :  { %310 = vmatprep.subr.mxu0 %v105_v28  ;;  %381 = vmatprep.subr.mxu1 %v107_v29  ;;  %v73_v44 = vld [vmem:[#allocation5 + $0x108] sm:$0xff]  ;;  %v75_v45 = vld [vmem:[#allocation5 + $0x118] sm:$0xff]  ;;  %v72_v46 = vld [vmem:[#allocation5 + $0x100] sm:$0xff] }
  0x2a   :  { %311 = vmatpush1.msra.mxu0 %v104_v30  ;;  %382 = vmatpush1.msra.mxu1 %v106_v31  ;;  %v74_v47 = vld [vmem:[#allocation5 + $0x110] sm:$0xff]  ;;  %v65_v48 = vld [vmem:[#allocation5 + $0xc8] sm:$0xff]  ;;  %v67_v49 = vld [vmem:[#allocation5 + $0xd8] sm:$0xff] }
  0x2b   :  { %312 = vmatprep.subr.mxu0 %v97_v32  ;;  %383 = vmatprep.subr.mxu1 %v99_v33  ;;  %v64_v50 = vld [vmem:[#allocation5 + $0xc0] sm:$0xff]  ;;  %v66_v51 = vld [vmem:[#allocation5 + $0xd0] sm:$0xff]  ;;  %v57_v52 = vld [vmem:[#allocation5 + $0x88] sm:$0xff] }
  0x2c   :  { %313 = vmatpush1.msra.mxu0 %v96_v34  ;;  %384 = vmatpush1.msra.mxu1 %v98_v35  ;;  %v59_v53 = vld [vmem:[#allocation5 + $0x98] sm:$0xff]  ;;  %v56_v54 = vld [vmem:[#allocation5 + $0x80] sm:$0xff]  ;;  %v58_v55 = vld [vmem:[#allocation5 + $0x90] sm:$0xff] }
  0x2d   :  { %314 = vmatprep.subr.mxu0 %v89_v36  ;;  %385 = vmatprep.subr.mxu1 %v91_v37  ;;  %v49_v56 = vld [vmem:[#allocation5 + $0x48] sm:$0xff]  ;;  %v51_v57 = vld [vmem:[#allocation5 + $0x58] sm:$0xff]  ;;  %v48_v58 = vld [vmem:[#allocation5 + $0x40] sm:$0xff] }
  0x2e   :  { %315 = vmatpush1.msra.mxu0 %v88_v38  ;;  %386 = vmatpush1.msra.mxu1 %v90_v39  ;;  %v50_v59 = vld [vmem:[#allocation5 + $0x50] sm:$0xff]  ;;  %v41_v60 = vld [vmem:[#allocation5 + $0x8] sm:$0xff]  ;;  %v43_v61 = vld [vmem:[#allocation5 + $0x18] sm:$0xff] }
  0x2f   :  { %316 = vmatprep.subr.mxu0 %v81_v40  ;;  %387 = vmatprep.subr.mxu1 %v83_v41  ;;  %v40_v62 = vld [vmem:[#allocation5] sm:$0xff]  ;;  %v42_v63 = vld [vmem:[#allocation5 + $0x10] sm:$0xff]  ;;  %v289_v0 = vld [vmem:[#allocation5 + $0x7c8] sm:$0xff] }
  0x30   :  { %317 = vmatpush1.msra.mxu0 %v80_v42  ;;  %388 = vmatpush1.msra.mxu1 %v82_v43  ;;  %v291_v1 = vld [vmem:[#allocation5 + $0x7d8] sm:$0xff]  ;;  %v288_v2 = vld [vmem:[#allocation5 + $0x7c0] sm:$0xff]  ;;  %v290_v3 = vld [vmem:[#allocation5 + $0x7d0] sm:$0xff] }
  0x31   :  { %318 = vmatprep.subr.mxu0 %v73_v44  ;;  %389 = vmatprep.subr.mxu1 %v75_v45  ;;  %v281_v4 = vld [vmem:[#allocation5 + $0x788] sm:$0xff]  ;;  %v283_v5 = vld [vmem:[#allocation5 + $0x798] sm:$0xff]  ;;  %v280_v6 = vld [vmem:[#allocation5 + $0x780] sm:$0xff] }
  0x32   :  { %319 = vmatpush1.msra.mxu0 %v72_v46  ;;  %390 = vmatpush1.msra.mxu1 %v74_v47  ;;  %v282_v7 = vld [vmem:[#allocation5 + $0x790] sm:$0xff]  ;;  %v273_v8 = vld [vmem:[#allocation5 + $0x748] sm:$0xff]  ;;  %v275_v9 = vld [vmem:[#allocation5 + $0x758] sm:$0xff] }
  0x33   :  { %320 = vmatprep.subr.mxu0 %v65_v48  ;;  %391 = vmatprep.subr.mxu1 %v67_v49  ;;  %v272_v10 = vld [vmem:[#allocation5 + $0x740] sm:$0xff]  ;;  %v274_v11 = vld [vmem:[#allocation5 + $0x750] sm:$0xff]  ;;  %v265_v12 = vld [vmem:[#allocation5 + $0x708] sm:$0xff] }
  0x34   :  { %321 = vmatpush1.msra.mxu0 %v64_v50  ;;  %392 = vmatpush1.msra.mxu1 %v66_v51  ;;  %v267_v13 = vld [vmem:[#allocation5 + $0x718] sm:$0xff]  ;;  %v264_v14 = vld [vmem:[#allocation5 + $0x700] sm:$0xff]  ;;  %v266_v15 = vld [vmem:[#allocation5 + $0x710] sm:$0xff] }
  0x35   :  { %322 = vmatprep.subr.mxu0 %v57_v52  ;;  %393 = vmatprep.subr.mxu1 %v59_v53  ;;  %v257_v16 = vld [vmem:[#allocation5 + $0x6c8] sm:$0xff]  ;;  %v259_v17 = vld [vmem:[#allocation5 + $0x6d8] sm:$0xff]  ;;  %v256_v18 = vld [vmem:[#allocation5 + $0x6c0] sm:$0xff] }
  0x36   :  { %323 = vmatpush1.msra.mxu0 %v56_v54  ;;  %394 = vmatpush1.msra.mxu1 %v58_v55  ;;  %v258_v19 = vld [vmem:[#allocation5 + $0x6d0] sm:$0xff]  ;;  %v249_v20 = vld [vmem:[#allocation5 + $0x688] sm:$0xff]  ;;  %v251_v21 = vld [vmem:[#allocation5 + $0x698] sm:$0xff] }
  0x37   :  { %324 = vmatprep.subr.mxu0 %v49_v56  ;;  %395 = vmatprep.subr.mxu1 %v51_v57  ;;  %v248_v22 = vld [vmem:[#allocation5 + $0x680] sm:$0xff]  ;;  %v250_v23 = vld [vmem:[#allocation5 + $0x690] sm:$0xff]  ;;  %v241_v24 = vld [vmem:[#allocation5 + $0x648] sm:$0xff] }
  0x38   :  { %325 = vmatpush1.msra.mxu0 %v48_v58  ;;  %396 = vmatpush1.msra.mxu1 %v50_v59  ;;  %v243_v25 = vld [vmem:[#allocation5 + $0x658] sm:$0xff]  ;;  %v240_v26 = vld [vmem:[#allocation5 + $0x640] sm:$0xff]  ;;  %v242_v27 = vld [vmem:[#allocation5 + $0x650] sm:$0xff] }
  0x39   :  { %326 = vmatprep.subr.mxu0 %v41_v60  ;;  %397 = vmatprep.subr.mxu1 %v43_v61  ;;  %v233_v28 = vld [vmem:[#allocation5 + $0x608] sm:$0xff]  ;;  %v235_v29 = vld [vmem:[#allocation5 + $0x618] sm:$0xff]  ;;  %v232_v30 = vld [vmem:[#allocation5 + $0x600] sm:$0xff] }
  0x3a   :  { %327 = vmatpush1.msra.mxu0 %v40_v62  ;;  %398 = vmatpush1.msra.mxu1 %v42_v63  ;;  %v234_v31 = vld [vmem:[#allocation5 + $0x610] sm:$0xff]  ;;  %v225_v32 = vld [vmem:[#allocation5 + $0x5c8] sm:$0xff]  ;;  %v227_v33 = vld [vmem:[#allocation5 + $0x5d8] sm:$0xff] }
  0x3b   :  { %328 = vmatprep.subr.mxu0 %v289_v0  ;;  %399 = vmatprep.subr.mxu1 %v291_v1  ;;  %v224_v34 = vld [vmem:[#allocation5 + $0x5c0] sm:$0xff]  ;;  %v226_v35 = vld [vmem:[#allocation5 + $0x5d0] sm:$0xff]  ;;  %v217_v36 = vld [vmem:[#allocation5 + $0x588] sm:$0xff] }
  0x3c   :  { %329 = vmatpush2.msra.mxu0 %v288_v2  ;;  %400 = vmatpush2.msra.mxu1 %v290_v3  ;;  %v219_v37 = vld [vmem:[#allocation5 + $0x598] sm:$0xff]  ;;  %v216_v38 = vld [vmem:[#allocation5 + $0x580] sm:$0xff]  ;;  %v218_v39 = vld [vmem:[#allocation5 + $0x590] sm:$0xff] }
  0x3d   :  { %330 = vmatprep.subr.mxu0 %v281_v4  ;;  %401 = vmatprep.subr.mxu1 %v283_v5  ;;  %v209_v40 = vld [vmem:[#allocation5 + $0x548] sm:$0xff]  ;;  %v211_v41 = vld [vmem:[#allocation5 + $0x558] sm:$0xff]  ;;  %v208_v42 = vld [vmem:[#allocation5 + $0x540] sm:$0xff] }
  0x3e   :  { %331 = vmatpush2.msra.mxu0 %v280_v6  ;;  %402 = vmatpush2.msra.mxu1 %v282_v7  ;;  %v210_v43 = vld [vmem:[#allocation5 + $0x550] sm:$0xff]  ;;  %v201_v44 = vld [vmem:[#allocation5 + $0x508] sm:$0xff]  ;;  %v203_v45 = vld [vmem:[#allocation5 + $0x518] sm:$0xff] }
  0x3f   :  { %332 = vmatprep.subr.mxu0 %v273_v8  ;;  %403 = vmatprep.subr.mxu1 %v275_v9  ;;  %v200_v46 = vld [vmem:[#allocation5 + $0x500] sm:$0xff]  ;;  %v202_v47 = vld [vmem:[#allocation5 + $0x510] sm:$0xff]  ;;  %v193_v48 = vld [vmem:[#allocation5 + $0x4c8] sm:$0xff] }
  0x40   :  { %333 = vmatpush2.msra.mxu0 %v272_v10  ;;  %404 = vmatpush2.msra.mxu1 %v274_v11  ;;  %v195_v49 = vld [vmem:[#allocation5 + $0x4d8] sm:$0xff]  ;;  %v192_v50 = vld [vmem:[#allocation5 + $0x4c0] sm:$0xff]  ;;  %v194_v51 = vld [vmem:[#allocation5 + $0x4d0] sm:$0xff] }
  0x41   :  { %334 = vmatprep.subr.mxu0 %v265_v12  ;;  %405 = vmatprep.subr.mxu1 %v267_v13  ;;  %v185_v52 = vld [vmem:[#allocation5 + $0x488] sm:$0xff]  ;;  %v187_v53 = vld [vmem:[#allocation5 + $0x498] sm:$0xff]  ;;  %v184_v54 = vld [vmem:[#allocation5 + $0x480] sm:$0xff] }
  0x42   :  { %335 = vmatpush2.msra.mxu0 %v264_v14  ;;  %406 = vmatpush2.msra.mxu1 %v266_v15  ;;  %v186_v55 = vld [vmem:[#allocation5 + $0x490] sm:$0xff]  ;;  %v177_v56 = vld [vmem:[#allocation5 + $0x448] sm:$0xff]  ;;  %v179_v57 = vld [vmem:[#allocation5 + $0x458] sm:$0xff] }
  0x43   :  { %336 = vmatprep.subr.mxu0 %v257_v16  ;;  %407 = vmatprep.subr.mxu1 %v259_v17  ;;  %v176_v58 = vld [vmem:[#allocation5 + $0x440] sm:$0xff]  ;;  %v178_v59 = vld [vmem:[#allocation5 + $0x450] sm:$0xff]  ;;  %v169_v60 = vld [vmem:[#allocation5 + $0x408] sm:$0xff] }
  0x44   :  { %337 = vmatpush2.msra.mxu0 %v256_v18  ;;  %408 = vmatpush2.msra.mxu1 %v258_v19  ;;  %v171_v61 = vld [vmem:[#allocation5 + $0x418] sm:$0xff]  ;;  %v168_v62 = vld [vmem:[#allocation5 + $0x400] sm:$0xff]  ;;  %v170_v0 = vld [vmem:[#allocation5 + $0x410] sm:$0xff] }
  0x45   :  { %338 = vmatprep.subr.mxu0 %v249_v20  ;;  %409 = vmatprep.subr.mxu1 %v251_v21  ;;  %v701_v63 = vld [vmem:[#allocation2 + $0x8] sm:$0xff]  ;;  %v703_v1 = vld [vmem:[#allocation2] sm:$0xff]  ;;  %v165_v2 = vld [vmem:[#allocation5 + $0x3e8] sm:$0xff] }
  0x46   :  { %339 = vmatpush2.msra.mxu0 %v248_v22  ;;  %410 = vmatpush2.msra.mxu1 %v250_v23  ;;  %v167_v3 = vld [vmem:[#allocation5 + $0x3f8] sm:$0xff]  ;;  %v164_v4 = vld [vmem:[#allocation5 + $0x3e0] sm:$0xff]  ;;  %v166_v5 = vld [vmem:[#allocation5 + $0x3f0] sm:$0xff] }
  0x47   :  { %340 = vmatprep.subr.mxu0 %v241_v24  ;;  %411 = vmatprep.subr.mxu1 %v243_v25  ;;  %v157_v6 = vld [vmem:[#allocation5 + $0x3a8] sm:$0xff]  ;;  %v159_v7 = vld [vmem:[#allocation5 + $0x3b8] sm:$0xff]  ;;  %v156_v8 = vld [vmem:[#allocation5 + $0x3a0] sm:$0xff] }
  0x48   :  { %341 = vmatpush2.msra.mxu0 %v240_v26  ;;  %412 = vmatpush2.msra.mxu1 %v242_v27  ;;  %v158_v9 = vld [vmem:[#allocation5 + $0x3b0] sm:$0xff]  ;;  %v149_v10 = vld [vmem:[#allocation5 + $0x368] sm:$0xff]  ;;  %v151_v11 = vld [vmem:[#allocation5 + $0x378] sm:$0xff] }
  0x49   :  { %342 = vmatprep.subr.mxu0 %v233_v28  ;;  %413 = vmatprep.subr.mxu1 %v235_v29  ;;  %v148_v12 = vld [vmem:[#allocation5 + $0x360] sm:$0xff]  ;;  %v150_v13 = vld [vmem:[#allocation5 + $0x370] sm:$0xff]  ;;  %v141_v14 = vld [vmem:[#allocation5 + $0x328] sm:$0xff] }
  0x4a   :  { %343 = vmatpush2.msra.mxu0 %v232_v30  ;;  %414 = vmatpush2.msra.mxu1 %v234_v31  ;;  %v143_v15 = vld [vmem:[#allocation5 + $0x338] sm:$0xff]  ;;  %v140_v16 = vld [vmem:[#allocation5 + $0x320] sm:$0xff]  ;;  %v142_v17 = vld [vmem:[#allocation5 + $0x330] sm:$0xff] }
  0x4b   :  { %344 = vmatprep.subr.mxu0 %v225_v32  ;;  %415 = vmatprep.subr.mxu1 %v227_v33  ;;  %v133_v18 = vld [vmem:[#allocation5 + $0x2e8] sm:$0xff]  ;;  %v135_v19 = vld [vmem:[#allocation5 + $0x2f8] sm:$0xff]  ;;  %v132_v20 = vld [vmem:[#allocation5 + $0x2e0] sm:$0xff] }
  0x4c   :  { %345 = vmatpush2.msra.mxu0 %v224_v34  ;;  %416 = vmatpush2.msra.mxu1 %v226_v35  ;;  %v134_v21 = vld [vmem:[#allocation5 + $0x2f0] sm:$0xff]  ;;  %v125_v22 = vld [vmem:[#allocation5 + $0x2a8] sm:$0xff]  ;;  %v127_v23 = vld [vmem:[#allocation5 + $0x2b8] sm:$0xff] }
  0x4d   :  { %346 = vmatprep.subr.mxu0 %v217_v36  ;;  %417 = vmatprep.subr.mxu1 %v219_v37  ;;  %v124_v24 = vld [vmem:[#allocation5 + $0x2a0] sm:$0xff]  ;;  %v126_v25 = vld [vmem:[#allocation5 + $0x2b0] sm:$0xff]  ;;  %v117_v26 = vld [vmem:[#allocation5 + $0x268] sm:$0xff] }
  0x4e   :  { %347 = vmatpush2.msra.mxu0 %v216_v38  ;;  %418 = vmatpush2.msra.mxu1 %v218_v39  ;;  %v119_v27 = vld [vmem:[#allocation5 + $0x278] sm:$0xff]  ;;  %v116_v28 = vld [vmem:[#allocation5 + $0x260] sm:$0xff]  ;;  %v118_v29 = vld [vmem:[#allocation5 + $0x270] sm:$0xff] }
  0x4f   :  { %348 = vmatprep.subr.mxu0 %v209_v40  ;;  %419 = vmatprep.subr.mxu1 %v211_v41  ;;  %v109_v30 = vld [vmem:[#allocation5 + $0x228] sm:$0xff]  ;;  %v111_v31 = vld [vmem:[#allocation5 + $0x238] sm:$0xff]  ;;  %v108_v32 = vld [vmem:[#allocation5 + $0x220] sm:$0xff] }
  0x50   :  { %349 = vmatpush2.msra.mxu0 %v208_v42  ;;  %420 = vmatpush2.msra.mxu1 %v210_v43  ;;  %v110_v33 = vld [vmem:[#allocation5 + $0x230] sm:$0xff]  ;;  %v101_v34 = vld [vmem:[#allocation5 + $0x1e8] sm:$0xff]  ;;  %v103_v35 = vld [vmem:[#allocation5 + $0x1f8] sm:$0xff] }
  0x51   :  { %350 = vmatprep.subr.mxu0 %v201_v44  ;;  %421 = vmatprep.subr.mxu1 %v203_v45  ;;  %v100_v36 = vld [vmem:[#allocation5 + $0x1e0] sm:$0xff]  ;;  %v102_v37 = vld [vmem:[#allocation5 + $0x1f0] sm:$0xff]  ;;  %v93_v38 = vld [vmem:[#allocation5 + $0x1a8] sm:$0xff] }
  0x52   :  { %351 = vmatpush2.msra.mxu0 %v200_v46  ;;  %422 = vmatpush2.msra.mxu1 %v202_v47  ;;  %v95_v39 = vld [vmem:[#allocation5 + $0x1b8] sm:$0xff]  ;;  %v92_v40 = vld [vmem:[#allocation5 + $0x1a0] sm:$0xff]  ;;  %v94_v41 = vld [vmem:[#allocation5 + $0x1b0] sm:$0xff] }
  0x53   :  { %352 = vmatprep.subr.mxu0 %v193_v48  ;;  %423 = vmatprep.subr.mxu1 %v195_v49  ;;  %v85_v42 = vld [vmem:[#allocation5 + $0x168] sm:$0xff]  ;;  %v87_v43 = vld [vmem:[#allocation5 + $0x178] sm:$0xff]  ;;  %v84_v44 = vld [vmem:[#allocation5 + $0x160] sm:$0xff] }
  0x54   :  { %353 = vmatpush2.msra.mxu0 %v192_v50  ;;  %424 = vmatpush2.msra.mxu1 %v194_v51  ;;  %v86_v45 = vld [vmem:[#allocation5 + $0x170] sm:$0xff]  ;;  %v77_v46 = vld [vmem:[#allocation5 + $0x128] sm:$0xff]  ;;  %v79_v47 = vld [vmem:[#allocation5 + $0x138] sm:$0xff] }
  0x55   :  { %354 = vmatprep.subr.mxu0 %v185_v52  ;;  %425 = vmatprep.subr.mxu1 %v187_v53  ;;  %v76_v48 = vld [vmem:[#allocation5 + $0x120] sm:$0xff]  ;;  %v78_v49 = vld [vmem:[#allocation5 + $0x130] sm:$0xff]  ;;  %v69_v50 = vld [vmem:[#allocation5 + $0xe8] sm:$0xff] }
  0x56   :  { %355 = vmatpush2.msra.mxu0 %v184_v54  ;;  %426 = vmatpush2.msra.mxu1 %v186_v55  ;;  %v71_v51 = vld [vmem:[#allocation5 + $0xf8] sm:$0xff]  ;;  %v68_v52 = vld [vmem:[#allocation5 + $0xe0] sm:$0xff]  ;;  %v70_v53 = vld [vmem:[#allocation5 + $0xf0] sm:$0xff] }
  0x57   :  { %356 = vmatprep.subr.mxu0 %v177_v56  ;;  %427 = vmatprep.subr.mxu1 %v179_v57  ;;  %v61_v54 = vld [vmem:[#allocation5 + $0xa8] sm:$0xff]  ;;  %v63_v55 = vld [vmem:[#allocation5 + $0xb8] sm:$0xff]  ;;  %v60_v56 = vld [vmem:[#allocation5 + $0xa0] sm:$0xff] }
  0x58   :  { %357 = vmatpush2.msra.mxu0 %v176_v58  ;;  %428 = vmatpush2.msra.mxu1 %v178_v59  ;;  %v62_v57 = vld [vmem:[#allocation5 + $0xb0] sm:$0xff]  ;;  %v53_v58 = vld [vmem:[#allocation5 + $0x68] sm:$0xff]  ;;  %v55_v59 = vld [vmem:[#allocation5 + $0x78] sm:$0xff] }
  0x59   :  { %358 = vmatprep.subr.mxu0 %v169_v60  ;;  %429 = vmatprep.subr.mxu1 %v171_v61  ;;  %v52_v60 = vld [vmem:[#allocation5 + $0x60] sm:$0xff]  ;;  %v54_v61 = vld [vmem:[#allocation5 + $0x70] sm:$0xff] }
  0x5a   :  { %359 = vmatpush2.msra.mxu0 %v168_v62  ;;  %360 = vmatprep.mubr.f32.mxu0 %v701_v63  ;;  %v45_v62 = vld [vmem:[#allocation5 + $0x28] sm:$0xff] }
  0x5b   :  { %430 = vmatpush2.msra.mxu1 %v170_v0  ;;  %431 = vmatprep.mubr.f32.mxu1 %v701_v63  ;;  %v47_v0 = vld [vmem:[#allocation5 + $0x38] sm:$0xff] }
  0x5c   :  { %361 = vmatmul.mubr.f32.vlgmr.msra.gmra.mxu0 %v703_v1  ;;  %432 = vmatmul.mubr.f32.vlgmr.msra.gmra.mxu1 %v703_v1 }
  0x5d   :  { %438 = vmatprep.subr.mxu0 %v165_v2  ;;  %509 = vmatprep.subr.mxu1 %v167_v3  ;;  %v44_v2 = vld [vmem:[#allocation5 + $0x20] sm:$0xff]  ;;  %v46_v3 = vld [vmem:[#allocation5 + $0x30] sm:$0xff] }
  0x5e   :  { %439 = vmatpush1.msra.mxu0 %v164_v4  ;;  %510 = vmatpush1.msra.mxu1 %v166_v5  ;;  %v293_v4 = vld [vmem:[#allocation5 + $0x7e8] sm:$0xff]  ;;  %v295_v5 = vld [vmem:[#allocation5 + $0x7f8] sm:$0xff] }
  0x5f   :  { %440 = vmatprep.subr.mxu0 %v157_v6  ;;  %511 = vmatprep.subr.mxu1 %v159_v7  ;;  %v292_v6 = vld [vmem:[#allocation5 + $0x7e0] sm:$0xff]  ;;  %v294_v7 = vld [vmem:[#allocation5 + $0x7f0] sm:$0xff] }
  0x60   :  { %441 = vmatpush1.msra.mxu0 %v156_v8  ;;  %512 = vmatpush1.msra.mxu1 %v158_v9  ;;  %v285_v8 = vld [vmem:[#allocation5 + $0x7a8] sm:$0xff]  ;;  %v287_v9 = vld [vmem:[#allocation5 + $0x7b8] sm:$0xff] }
  0x61   :  { %442 = vmatprep.subr.mxu0 %v149_v10  ;;  %513 = vmatprep.subr.mxu1 %v151_v11  ;;  %v284_v10 = vld [vmem:[#allocation5 + $0x7a0] sm:$0xff]  ;;  %v286_v11 = vld [vmem:[#allocation5 + $0x7b0] sm:$0xff] }
  0x62   :  { %443 = vmatpush1.msra.mxu0 %v148_v12  ;;  %514 = vmatpush1.msra.mxu1 %v150_v13  ;;  %v277_v12 = vld [vmem:[#allocation5 + $0x768] sm:$0xff]  ;;  %v279_v13 = vld [vmem:[#allocation5 + $0x778] sm:$0xff] }
  0x63   :  { %444 = vmatprep.subr.mxu0 %v141_v14  ;;  %515 = vmatprep.subr.mxu1 %v143_v15  ;;  %v276_v14 = vld [vmem:[#allocation5 + $0x760] sm:$0xff]  ;;  %v278_v15 = vld [vmem:[#allocation5 + $0x770] sm:$0xff] }
  0x64   :  { %445 = vmatpush1.msra.mxu0 %v140_v16  ;;  %516 = vmatpush1.msra.mxu1 %v142_v17  ;;  %v269_v16 = vld [vmem:[#allocation5 + $0x728] sm:$0xff]  ;;  %v271_v17 = vld [vmem:[#allocation5 + $0x738] sm:$0xff] }
  0x65   :  { %446 = vmatprep.subr.mxu0 %v133_v18  ;;  %517 = vmatprep.subr.mxu1 %v135_v19  ;;  %v268_v18 = vld [vmem:[#allocation5 + $0x720] sm:$0xff]  ;;  %v270_v19 = vld [vmem:[#allocation5 + $0x730] sm:$0xff] }
  0x66   :  { %447 = vmatpush1.msra.mxu0 %v132_v20  ;;  %518 = vmatpush1.msra.mxu1 %v134_v21  ;;  %v261_v20 = vld [vmem:[#allocation5 + $0x6e8] sm:$0xff]  ;;  %v263_v21 = vld [vmem:[#allocation5 + $0x6f8] sm:$0xff] }
  0x67   :  { %448 = vmatprep.subr.mxu0 %v125_v22  ;;  %519 = vmatprep.subr.mxu1 %v127_v23  ;;  %v260_v22 = vld [vmem:[#allocation5 + $0x6e0] sm:$0xff]  ;;  %v262_v23 = vld [vmem:[#allocation5 + $0x6f0] sm:$0xff] }
  0x68   :  { %449 = vmatpush1.msra.mxu0 %v124_v24  ;;  %520 = vmatpush1.msra.mxu1 %v126_v25  ;;  %v253_v24 = vld [vmem:[#allocation5 + $0x6a8] sm:$0xff]  ;;  %v255_v25 = vld [vmem:[#allocation5 + $0x6b8] sm:$0xff] }
  0x69   :  { %450 = vmatprep.subr.mxu0 %v117_v26  ;;  %521 = vmatprep.subr.mxu1 %v119_v27  ;;  %v252_v26 = vld [vmem:[#allocation5 + $0x6a0] sm:$0xff]  ;;  %v254_v27 = vld [vmem:[#allocation5 + $0x6b0] sm:$0xff] }
  0x6a   :  { %451 = vmatpush1.msra.mxu0 %v116_v28  ;;  %522 = vmatpush1.msra.mxu1 %v118_v29  ;;  %v245_v28 = vld [vmem:[#allocation5 + $0x668] sm:$0xff]  ;;  %v247_v29 = vld [vmem:[#allocation5 + $0x678] sm:$0xff] }
  0x6b   :  { %452 = vmatprep.subr.mxu0 %v109_v30  ;;  %523 = vmatprep.subr.mxu1 %v111_v31  ;;  %v244_v30 = vld [vmem:[#allocation5 + $0x660] sm:$0xff]  ;;  %v246_v31 = vld [vmem:[#allocation5 + $0x670] sm:$0xff] }
  0x6c   :  { %453 = vmatpush1.msra.mxu0 %v108_v32  ;;  %524 = vmatpush1.msra.mxu1 %v110_v33  ;;  %v237_v32 = vld [vmem:[#allocation5 + $0x628] sm:$0xff]  ;;  %v239_v33 = vld [vmem:[#allocation5 + $0x638] sm:$0xff] }
  0x6d   :  { %454 = vmatprep.subr.mxu0 %v101_v34  ;;  %525 = vmatprep.subr.mxu1 %v103_v35  ;;  %v236_v34 = vld [vmem:[#allocation5 + $0x620] sm:$0xff]  ;;  %v238_v35 = vld [vmem:[#allocation5 + $0x630] sm:$0xff] }
  0x6e   :  { %455 = vmatpush1.msra.mxu0 %v100_v36  ;;  %526 = vmatpush1.msra.mxu1 %v102_v37  ;;  %v229_v36 = vld [vmem:[#allocation5 + $0x5e8] sm:$0xff]  ;;  %v231_v37 = vld [vmem:[#allocation5 + $0x5f8] sm:$0xff] }
  0x6f   :  { %456 = vmatprep.subr.mxu0 %v93_v38  ;;  %527 = vmatprep.subr.mxu1 %v95_v39  ;;  %v228_v38 = vld [vmem:[#allocation5 + $0x5e0] sm:$0xff]  ;;  %v230_v39 = vld [vmem:[#allocation5 + $0x5f0] sm:$0xff] }
  0x70   :  { %457 = vmatpush1.msra.mxu0 %v92_v40  ;;  %528 = vmatpush1.msra.mxu1 %v94_v41  ;;  %v221_v40 = vld [vmem:[#allocation5 + $0x5a8] sm:$0xff]  ;;  %v223_v41 = vld [vmem:[#allocation5 + $0x5b8] sm:$0xff] }
  0x71   :  { %458 = vmatprep.subr.mxu0 %v85_v42  ;;  %529 = vmatprep.subr.mxu1 %v87_v43  ;;  %v220_v42 = vld [vmem:[#allocation5 + $0x5a0] sm:$0xff]  ;;  %v222_v43 = vld [vmem:[#allocation5 + $0x5b0] sm:$0xff] }
  0x72   :  { %459 = vmatpush1.msra.mxu0 %v84_v44  ;;  %530 = vmatpush1.msra.mxu1 %v86_v45  ;;  %v213_v44 = vld [vmem:[#allocation5 + $0x568] sm:$0xff]  ;;  %v215_v45 = vld [vmem:[#allocation5 + $0x578] sm:$0xff] }
  0x73   :  { %460 = vmatprep.subr.mxu0 %v77_v46  ;;  %531 = vmatprep.subr.mxu1 %v79_v47  ;;  %v212_v46 = vld [vmem:[#allocation5 + $0x560] sm:$0xff]  ;;  %v214_v47 = vld [vmem:[#allocation5 + $0x570] sm:$0xff] }
  0x74   :  { %461 = vmatpush1.msra.mxu0 %v76_v48  ;;  %532 = vmatpush1.msra.mxu1 %v78_v49  ;;  %v205_v48 = vld [vmem:[#allocation5 + $0x528] sm:$0xff]  ;;  %v207_v49 = vld [vmem:[#allocation5 + $0x538] sm:$0xff] }
  0x75   :  { %462 = vmatprep.subr.mxu0 %v69_v50  ;;  %533 = vmatprep.subr.mxu1 %v71_v51  ;;  %v204_v50 = vld [vmem:[#allocation5 + $0x520] sm:$0xff]  ;;  %v206_v51 = vld [vmem:[#allocation5 + $0x530] sm:$0xff] }
  0x76   :  { %463 = vmatpush1.msra.mxu0 %v68_v52  ;;  %534 = vmatpush1.msra.mxu1 %v70_v53  ;;  %v197_v52 = vld [vmem:[#allocation5 + $0x4e8] sm:$0xff]  ;;  %v199_v53 = vld [vmem:[#allocation5 + $0x4f8] sm:$0xff] }
  0x77   :  { %464 = vmatprep.subr.mxu0 %v61_v54  ;;  %535 = vmatprep.subr.mxu1 %v63_v55  ;;  %v196_v54 = vld [vmem:[#allocation5 + $0x4e0] sm:$0xff]  ;;  %v198_v55 = vld [vmem:[#allocation5 + $0x4f0] sm:$0xff] }
  0x78   :  { %465 = vmatpush1.msra.mxu0 %v60_v56  ;;  %536 = vmatpush1.msra.mxu1 %v62_v57  ;;  %v189_v56 = vld [vmem:[#allocation5 + $0x4a8] sm:$0xff]  ;;  %v191_v57 = vld [vmem:[#allocation5 + $0x4b8] sm:$0xff] }
  0x79   :  { %466 = vmatprep.subr.mxu0 %v53_v58  ;;  %537 = vmatprep.subr.mxu1 %v55_v59  ;;  %v188_v58 = vld [vmem:[#allocation5 + $0x4a0] sm:$0xff]  ;;  %v190_v59 = vld [vmem:[#allocation5 + $0x4b0] sm:$0xff] }
  0x7a   :  { %467 = vmatpush1.msra.mxu0 %v52_v60  ;;  %538 = vmatpush1.msra.mxu1 %v54_v61  ;;  %v181_v60 = vld [vmem:[#allocation5 + $0x468] sm:$0xff]  ;;  %v183_v61 = vld [vmem:[#allocation5 + $0x478] sm:$0xff] }
  0x7b   :  { %468 = vmatprep.subr.mxu0 %v45_v62  ;;  %539 = vmatprep.subr.mxu1 %v47_v0  ;;  %v180_v62 = vld [vmem:[#allocation5 + $0x460] sm:$0xff]  ;;  %v182_v0 = vld [vmem:[#allocation5 + $0x470] sm:$0xff] }
  0x7c   :  { %469 = vmatpush1.msra.mxu0 %v44_v2  ;;  %540 = vmatpush1.msra.mxu1 %v46_v3  ;;  %v173_v2 = vld [vmem:[#allocation5 + $0x428] sm:$0xff]  ;;  %v175_v3 = vld [vmem:[#allocation5 + $0x438] sm:$0xff] }
  0x7d   :  { %470 = vmatprep.subr.mxu0 %v293_v4  ;;  %541 = vmatprep.subr.mxu1 %v295_v5  ;;  %v172_v4 = vld [vmem:[#allocation5 + $0x420] sm:$0xff]  ;;  %v174_v5 = vld [vmem:[#allocation5 + $0x430] sm:$0xff] }
  0x7e   :  { %471 = vmatpush2.msra.mxu0 %v292_v6  ;;  %542 = vmatpush2.msra.mxu1 %v294_v7 }
  0x7f   :  { %472 = vmatprep.subr.mxu0 %v285_v8  ;;  %543 = vmatprep.subr.mxu1 %v287_v9 }
  0x80   :  { %473 = vmatpush2.msra.mxu0 %v284_v10  ;;  %544 = vmatpush2.msra.mxu1 %v286_v11 }
  0x81   :  { %474 = vmatprep.subr.mxu0 %v277_v12  ;;  %545 = vmatprep.subr.mxu1 %v279_v13 }
  0x82   :  { %475 = vmatpush2.msra.mxu0 %v276_v14  ;;  %546 = vmatpush2.msra.mxu1 %v278_v15 }
  0x83   :  { %476 = vmatprep.subr.mxu0 %v269_v16  ;;  %547 = vmatprep.subr.mxu1 %v271_v17 }
  0x84   :  { %477 = vmatpush2.msra.mxu0 %v268_v18  ;;  %548 = vmatpush2.msra.mxu1 %v270_v19 }
  0x85   :  { %478 = vmatprep.subr.mxu0 %v261_v20  ;;  %549 = vmatprep.subr.mxu1 %v263_v21 }
  0x86   :  { %479 = vmatpush2.msra.mxu0 %v260_v22  ;;  %550 = vmatpush2.msra.mxu1 %v262_v23 }
  0x87   :  { %480 = vmatprep.subr.mxu0 %v253_v24  ;;  %551 = vmatprep.subr.mxu1 %v255_v25 }
  0x88   :  { %481 = vmatpush2.msra.mxu0 %v252_v26  ;;  %552 = vmatpush2.msra.mxu1 %v254_v27 }
  0x89   :  { %482 = vmatprep.subr.mxu0 %v245_v28  ;;  %553 = vmatprep.subr.mxu1 %v247_v29 }
  0x8a   :  { %483 = vmatpush2.msra.mxu0 %v244_v30  ;;  %554 = vmatpush2.msra.mxu1 %v246_v31 }
  0x8b   :  { %484 = vmatprep.subr.mxu0 %v237_v32  ;;  %555 = vmatprep.subr.mxu1 %v239_v33 }
  0x8c   :  { %485 = vmatpush2.msra.mxu0 %v236_v34  ;;  %556 = vmatpush2.msra.mxu1 %v238_v35 }
  0x8d   :  { %486 = vmatprep.subr.mxu0 %v229_v36  ;;  %557 = vmatprep.subr.mxu1 %v231_v37 }
  0x8e   :  { %487 = vmatpush2.msra.mxu0 %v228_v38  ;;  %558 = vmatpush2.msra.mxu1 %v230_v39 }
  0x8f   :  { %488 = vmatprep.subr.mxu0 %v221_v40  ;;  %559 = vmatprep.subr.mxu1 %v223_v41 }
  0x90   :  { %489 = vmatpush2.msra.mxu0 %v220_v42  ;;  %560 = vmatpush2.msra.mxu1 %v222_v43 }
  0x91   :  { %490 = vmatprep.subr.mxu0 %v213_v44  ;;  %561 = vmatprep.subr.mxu1 %v215_v45 }
  0x92   :  { %491 = vmatpush2.msra.mxu0 %v212_v46  ;;  %562 = vmatpush2.msra.mxu1 %v214_v47 }
  0x93   :  { %492 = vmatprep.subr.mxu0 %v205_v48  ;;  %563 = vmatprep.subr.mxu1 %v207_v49 }
  0x94   :  { %493 = vmatpush2.msra.mxu0 %v204_v50  ;;  %564 = vmatpush2.msra.mxu1 %v206_v51 }
  0x95   :  { %494 = vmatprep.subr.mxu0 %v197_v52  ;;  %565 = vmatprep.subr.mxu1 %v199_v53 }
  0x96   :  { %495 = vmatpush2.msra.mxu0 %v196_v54  ;;  %566 = vmatpush2.msra.mxu1 %v198_v55 }
  0x97   :  { %496 = vmatprep.subr.mxu0 %v189_v56  ;;  %567 = vmatprep.subr.mxu1 %v191_v57 }
  0x98   :  { %497 = vmatpush2.msra.mxu0 %v188_v58  ;;  %568 = vmatpush2.msra.mxu1 %v190_v59 }
  0x99   :  { %498 = vmatprep.subr.mxu0 %v181_v60  ;;  %569 = vmatprep.subr.mxu1 %v183_v61 }
  0x9a   :  { %499 = vmatpush2.msra.mxu0 %v180_v62  ;;  %570 = vmatpush2.msra.mxu1 %v182_v0 }
  0x9b   :  { %500 = vmatprep.subr.mxu0 %v173_v2  ;;  %571 = vmatprep.subr.mxu1 %v175_v3 }
  0x9c   :  { %501 = vmatpush2.msra.mxu0 %v172_v4  ;;  %502 = vmatprep.mubr.f32.mxu0 %v701_v63 }
  0x9d   :  { %572 = vmatpush2.msra.mxu1 %v174_v5  ;;  %573 = vmatprep.mubr.f32.mxu1 %v701_v63 }
  0x9e   :  { %503 = vmatmul.mubr.f32.vlgmr.msra.gmra.mxu0 %v703_v1  ;;  %574 = vmatmul.mubr.f32.vlgmr.msra.gmra.mxu1 %v703_v1 }
 0x11c   :  { %v362_v6 = vpop.f32.mrf.mxu0  ;;  %v433_v7 = vpop.f32.mrf.mxu1 }
 0x11d   :  { %580 = vst [vmem:[#allocation7] sm:$0xff] %v362_v6  ;;  %582 = vst [vmem:[#allocation7 + $0x10] sm:$0xff] %v433_v7 }
 0x11e   :  { %v364_v8 = vpop.f32.mrf.mxu0  ;;  %v435_v9 = vpop.f32.mrf.mxu1 }
 0x11f   :  { %581 = vst [vmem:[#allocation7 + $0x8] sm:$0xff] %v364_v8  ;;  %583 = vst [vmem:[#allocation7 + $0x18] sm:$0xff] %v435_v9 }
 0x15e   :  { %v504_v10 = vpop.f32.mrf.mxu0  ;;  %v575_v11 = vpop.f32.mrf.mxu1 }
 0x15f   :  { %584 = vst [vmem:[#allocation7 + $0x20] sm:$0xff] %v504_v10  ;;  %586 = vst [vmem:[#allocation7 + $0x30] sm:$0xff] %v575_v11 }
 0x160   :  { %v506_v63 = vpop.f32.mrf.mxu0  ;;  %v577_v12 = vpop.f32.mrf.mxu1 }
 0x161   :  { %585 = vst [vmem:[#allocation7 + $0x28] sm:$0xff] %v506_v63  ;;  %587 = vst [vmem:[#allocation7 + $0x38] sm:$0xff] %v577_v12 }
 0x162   :  { %660 = shalt.err (!%p657_p0)
}
 0x163   :  { %597 = dma.vmem_to_hbm [thread:$0]  %s595_s1, 1024, %s718_s2, [#allocation4]  }
 0x164   :  { %673 = dma.done.wait [#allocation4], 1024  }
 0x165   :  { %674 = vsyncadd [#allocation4], 4294966272 }
 0x166   :  { %601 = vsyncpa [#allocation3], 1 }
 0x167   :  { %602 = vsyncpa [#allocation6], 1 }
 0x168   :  { %603 = vsyncpa [#allocation4], 1 }

</bundles_post_ra>
